<compile_context>
chip_gen: v7x
topology: tpu7x:2x2x1
jax: 0.10.0
libtpu: 0.0.40
codegen_flags: <defaults>
</compile_context>

<pallas_src>
import jax
import jax.numpy as jnp
from jax.experimental import pallas as pl
from jax.experimental.pallas import tpu as pltpu

_HPAD = 128   # lane-dense hidden width (>= 64); do NOT raise to 256 (mem-bound kernel)


def domain_classifier_kernel(f_ref, w1_ref, b1_ref, w2_ref, b2_ref, o_ref):
    # In-kernel cast to bf16 for the MXU (no-op if f is already bf16); rides the VPU
    # slot and is hidden under the tile DMA.
    x = f_ref[...].astype(jnp.bfloat16)
    # Hidden layer: (tb, feat_dim) @ (feat_dim, 128), f32 accumulation on the MXU.
    h = jnp.dot(x, w1_ref[...], preferred_element_type=jnp.float32)
    h = jnp.maximum(h + b1_ref[...], 0.0)                      # bias + ReLU (VPU)
    # Output layer: (tb, 128) @ (128, 2), f32 accumulation; narrow lane store.
    out = jnp.dot(h.astype(jnp.bfloat16), w2_ref[...],
                  preferred_element_type=jnp.float32)
    o_ref[...] = (out + b2_ref[...]).astype(o_ref.dtype)


def _pick_block_b(B, feat_dim, n_out, in_itemsize):
    """Rows per batch tile.

    Budget the double-buffered per-tile VMEM (input tile + f32 output tile) against
    ~24 MiB so the pipeline plus resident weights stays well under the 48 MiB
    vmem_limit (v7x physical VMEM = 64 MiB); cap at 8192 rows.  For large batches
    guarantee >= 2 grid steps so v7x's 2 TensorCores both get work.
    """
    per_row = 2 * feat_dim * in_itemsize + 2 * n_out * 4
    tb = (24 * 1024 * 1024) // max(per_row, 1)
    tb = min(8192, max(256, (tb // 256) * 256))
    if B <= tb:
        if B > 2048:
            # Split into (at least) two tiles of equal size, rounded up to the
            # f32 sublane pack; the partial last block is masked by Pallas.
            half = ((B + 1) // 2 + 7) // 8 * 8
            return half
        return B          # single tile == full batch (block equals full array dim)
    return tb


def domain_classifier(f, w1, b1, w2, b2):
    """f: (B, feat_dim), any float dtype (f32 or bf16).  Weights stored transposed
    vs PyTorch: w1 (feat_dim, 64), b1 (1, 64), w2 (64, 2), b2 (1, 2).
    Returns (B, 2) f32 logits."""
    B, feat_dim = f.shape
    hidden = w1.shape[1]
    n_out = w2.shape[1]

    # --- Zero-pad hidden dim to a lane-dense width (tiny, one-time weight ops).
    #     Padded b1 entries are 0 -> ReLU(0)=0 -> logits unchanged. ---
    if hidden < _HPAD:
        w1 = jnp.pad(w1, ((0, 0), (0, _HPAD - hidden)))
        b1 = jnp.pad(b1, ((0, 0), (0, _HPAD - hidden)))
        w2 = jnp.pad(w2, ((0, _HPAD - hidden), (0, 0)))

    # Weights streamed once as bf16 (constant index_map -> VMEM resident); biases f32.
    w1_bf = w1.astype(jnp.bfloat16)
    w2_bf = w2.astype(jnp.bfloat16)
    b1 = b1.astype(jnp.float32)
    b2 = b2.astype(jnp.float32)

    tb = _pick_block_b(B, feat_dim, n_out, f.dtype.itemsize)
    grid = (pl.cdiv(B, tb),)

    out = pl.pallas_call(
        domain_classifier_kernel,
        out_shape=jax.ShapeDtypeStruct((B, n_out), jnp.float32),
        grid_spec=pltpu.PrefetchScalarGridSpec(
            num_scalar_prefetch=0,
            grid=grid,
            in_specs=[
                pl.BlockSpec((tb, feat_dim), lambda i: (i, 0)),       # f: tiled over batch
                pl.BlockSpec((feat_dim, _HPAD), lambda i: (0, 0)),    # W1: resident
                pl.BlockSpec((1, _HPAD), lambda i: (0, 0)),           # b1: resident
                pl.BlockSpec((_HPAD, n_out), lambda i: (0, 0)),       # W2: resident
                pl.BlockSpec((1, n_out), lambda i: (0, 0)),           # b2: resident
            ],
            out_specs=pl.BlockSpec((tb, n_out), lambda i: (i, 0)),    # narrow f32 store
        ),
        compiler_params=pltpu.CompilerParams(
            dimension_semantics=("parallel",),          # shards batch tiles on v7x's 2 TCs
            vmem_limit_bytes=48 * 1024 * 1024,          # > v5e 16 MiB default, < v7x 64 MiB
        ),
    )(f, w1_bf, b1, w2_bf, b2)

    return out


def init_params(key, feat_dim, hidden=64, n_out=2):
    """Deterministic init mirroring nn.Linear default (uniform(-1/sqrt(fan_in), +))."""
    k1, k2, k3, k4 = jax.random.split(key, 4)
    bound1 = 1.0 / jnp.sqrt(feat_dim)
    bound2 = 1.0 / jnp.sqrt(hidden)
    w1 = jax.random.uniform(k1, (feat_dim, hidden), jnp.float32, -bound1, bound1)
    b1 = jax.random.uniform(k2, (1, hidden), jnp.float32, -bound1, bound1)
    w2 = jax.random.uniform(k3, (hidden, n_out), jnp.float32, -bound2, bound2)
    b2 = jax.random.uniform(k4, (1, n_out), jnp.float32, -bound2, bound2)
    return w1, b1, w2, b2


if __name__ == "__main__":
    key = jax.random.PRNGKey(0)
    k_in, k_params = jax.random.split(key)

    B, feat_dim = 2, 32   # small shapes consistent with the module
    f = jax.random.normal(k_in, (B, feat_dim), jnp.float32)
    w1, b1, w2, b2 = init_params(k_params, feat_dim)

    out = domain_classifier(f, w1, b1, w2, b2)
    out = jax.block_until_ready(out)

    # Reference in plain JAX f32 (kernel uses bf16 MXU inputs, f32 accumulation).
    ref = jnp.maximum(f @ w1 + b1, 0.0) @ w2 + b2
    assert out.shape == (B, 2), out.shape
    assert jnp.allclose(out, ref, atol=3e-2, rtol=3e-2), (out, ref)

    print("KERNEL_OK")
</pallas_src>

<mosaic_0001>
module attributes {stable_mosaic.version = 11 : i64} {
  func.func @domain_classifier_kernel(%arg0: i32, %arg1: memref<2x32xf32, #tpu.memory_space<vmem>>, %arg2: memref<32x128xbf16, #tpu.memory_space<vmem>>, %arg3: memref<1x128xf32, #tpu.memory_space<vmem>>, %arg4: memref<128x2xbf16, #tpu.memory_space<vmem>>, %arg5: memref<1x2xf32, #tpu.memory_space<vmem>>, %arg6: memref<2x2xf32, #tpu.memory_space<vmem>>) attributes {dimension_semantics = [#tpu.dimension_semantics<parallel>], iteration_bounds = array<i64: 1>, scalar_prefetch = 0 : i64, scratch_operands = 0 : i64, tpu.core_type = #tpu.core_type<tc>, window_params = [{transform_indices = @transform_0, window_bounds = array<i64: 2, 32>}, {pipeline_mode = #tpu.pipeline_mode<synchronous>, transform_indices = @transform_1, window_bounds = array<i64: 32, 128>}, {pipeline_mode = #tpu.pipeline_mode<synchronous>, transform_indices = @transform_2, window_bounds = array<i64: 1, 128>}, {pipeline_mode = #tpu.pipeline_mode<synchronous>, transform_indices = @transform_3, window_bounds = array<i64: 128, 2>}, {pipeline_mode = #tpu.pipeline_mode<synchronous>, transform_indices = @transform_4, window_bounds = array<i64: 1, 2>}, {transform_indices = @transform_5, window_bounds = array<i64: 2, 2>}]} {
    %c0 = arith.constant 0 : index
    %c0_0 = arith.constant 0 : index
    %0 = vector.load %arg1[%c0, %c0_0] : memref<2x32xf32, #tpu.memory_space<vmem>>, vector<2x32xf32>
    %1 = arith.truncf %0 : vector<2x32xf32> to vector<2x32xbf16>
    %c0_1 = arith.constant 0 : index
    %c0_2 = arith.constant 0 : index
    %2 = vector.load %arg2[%c0_1, %c0_2] : memref<32x128xbf16, #tpu.memory_space<vmem>>, vector<32x128xbf16>
    %cst = arith.constant dense<0.000000e+00> : vector<2x128xf32>
    %3 = tpu.matmul %1, %2, %cst {dimension_numbers = #tpu.dot_dimension_numbers<[1], [0], [0], [1], [0, 0, 1, 1], [], []>} : vector<2x32xbf16>, vector<32x128xbf16>, vector<2x128xf32> -> vector<2x128xf32>
    %c0_3 = arith.constant 0 : index
    %c0_4 = arith.constant 0 : index
    %4 = vector.load %arg3[%c0_3, %c0_4] : memref<1x128xf32, #tpu.memory_space<vmem>>, vector<1x128xf32>
    %5 = vector.broadcast %4 : vector<1x128xf32> to vector<2x128xf32>
    %6 = arith.addf %3, %5 : vector<2x128xf32>
    %cst_5 = arith.constant 0.000000e+00 : f32
    %7 = vector.broadcast %cst_5 : f32 to vector<2x128xf32>
    %8 = arith.maximumf %6, %7 : vector<2x128xf32>
    %9 = arith.truncf %8 : vector<2x128xf32> to vector<2x128xbf16>
    %c0_6 = arith.constant 0 : index
    %c0_7 = arith.constant 0 : index
    %10 = vector.load %arg4[%c0_6, %c0_7] : memref<128x2xbf16, #tpu.memory_space<vmem>>, vector<128x2xbf16>
    %cst_8 = arith.constant dense<0.000000e+00> : vector<2x2xf32>
    %11 = tpu.matmul %9, %10, %cst_8 {dimension_numbers = #tpu.dot_dimension_numbers<[1], [0], [0], [1], [0, 0, 1, 1], [], []>} : vector<2x128xbf16>, vector<128x2xbf16>, vector<2x2xf32> -> vector<2x2xf32>
    %c0_9 = arith.constant 0 : index
    %c0_10 = arith.constant 0 : index
    %12 = vector.load %arg5[%c0_9, %c0_10] : memref<1x2xf32, #tpu.memory_space<vmem>>, vector<1x2xf32>
    %13 = vector.broadcast %12 : vector<1x2xf32> to vector<2x2xf32>
    %14 = arith.addf %11, %13 : vector<2x2xf32>
    %c0_11 = arith.constant 0 : index
    %c0_12 = arith.constant 0 : index
    %15 = vector.load %arg6[%c0_11, %c0_12] : memref<2x2xf32, #tpu.memory_space<vmem>>, vector<2x2xf32>
    tpu.vector_store %arg6[%c0_11, %c0_12], %14 {strides = array<i32>} : memref<2x2xf32, #tpu.memory_space<vmem>>, vector<2x2xf32>,
    return
  }
  func.func @transform_0(%arg0: i32) -> (i32, i32) {
    %c0_i32 = arith.constant 0 : i32
    %c0_i32_0 = arith.constant 0 : i32
    return %arg0, %c0_i32 : i32, i32
  }
  func.func @transform_1(%arg0: i32) -> (i32, i32) {
    %c0_i32 = arith.constant 0 : i32
    %c0_i32_0 = arith.constant 0 : i32
    %c0_i32_1 = arith.constant 0 : i32
    return %c0_i32, %c0_i32_0 : i32, i32
  }
  func.func @transform_2(%arg0: i32) -> (i32, i32) {
    %c0_i32 = arith.constant 0 : i32
    %c0_i32_0 = arith.constant 0 : i32
    %c0_i32_1 = arith.constant 0 : i32
    return %c0_i32, %c0_i32_0 : i32, i32
  }
  func.func @transform_3(%arg0: i32) -> (i32, i32) {
    %c0_i32 = arith.constant 0 : i32
    %c0_i32_0 = arith.constant 0 : i32
    %c0_i32_1 = arith.constant 0 : i32
    return %c0_i32, %c0_i32_0 : i32, i32
  }
  func.func @transform_4(%arg0: i32) -> (i32, i32) {
    %c0_i32 = arith.constant 0 : i32
    %c0_i32_0 = arith.constant 0 : i32
    %c0_i32_1 = arith.constant 0 : i32
    return %c0_i32, %c0_i32_0 : i32, i32
  }
  func.func @transform_5(%arg0: i32) -> (i32, i32) {
    %c0_i32 = arith.constant 0 : i32
    %c0_i32_0 = arith.constant 0 : i32
    return %arg0, %c0_i32 : i32, i32
  }
}

</mosaic_0001>

<bundles_post_ra>
// kernel: tpu_custom_call.1
= control target key start
LH: loop header
LB: loop body
LE: loop exit
PB: predicated region body
PF: predicated region fallthrough
CT: control target
= control target key end

     0   :  { %v310_v1 = vmov 0.0   ;;  %vm311_vm0 = vmmov 0   ;;  %vm47_vm1 = vcmask 261120   ;;  %s394_s0 = inlined_call_operand.vmem [shape: f32[2,32], index: 0, kind: input, shape index: {}]   ;;  %s395_s1 = inlined_call_operand.vmem [shape: bf16[32,128], index: 1, kind: input, shape index: {}]   ;;  %s396_s2 = inlined_call_operand.vmem [shape: f32[1,128], index: 2, kind: input, shape index: {}]   ;;  %s397_s3 = inlined_call_operand.vmem [shape: bf16[128,2], index: 3, kind: input, shape index: {}]   ;;  %s398_s4 = inlined_call_operand.vmem [shape: f32[1,2], index: 4, kind: input, shape index: {}]   ;;  %s399_s5 = inlined_call_operand.hbm [shape: f32[2,2], index: 5, kind: output, shape index: {}]  }
   0x1   :  { %v276_v0 = vld [vmem:[%s395_s1] sm:$0xff]   ;;  %245 = vmatprep.subr.bf16.mxu0 %v310_v1  ;;  %v277_v2 = vld [vmem:[%s395_s1 + $0x8] sm:$0xff]   ;;  %253 = vmatprep.subr.bf16.mxu1 %v310_v1  ;;  %v280_v7 = vld [vmem:[%s397_s3 + $0x10] sm:$0xff]  }
   0x2   :  { %246 = vmatpush3.bf16.msra.mxu0 %v276_v0  ;;  %249 = vmatprep.mubr.msk.bf16.mxu0 %vm311_vm0, %v310_v1  ;;  %v22_v3 = vld [vmem:[%s394_s0] sm:$0x3]  ;;  %v279_v5 = vld [vmem:[%s397_s3 + $0x8] sm:$0xff]  }
   0x3   :  { %v278_v4 = vld [vmem:[%s397_s3] sm:$0xff]   ;;  %247 = vmatprep.subr.bf16.mxu0 %v310_v1  ;;  %269 = vmatprep.mubr.msk.bf16.mxu1 %vm311_vm0, %v310_v1  ;;  %v23_v6 = vpack.c.bf16 %v22_v3, %v22_v3 }
   0x4   :  { %254 = vmatpush3.bf16.msra.mxu1 %v278_v4 }
   0x5   :  { %255 = vmatprep.subr.bf16.mxu1 %v310_v1 }
   0x6   :  { %248 = vmatpush3.bf16.msra.mxu0 %v277_v2 }
   0x8   :  { %256 = vmatpush3.bf16.msra.mxu1 %v279_v5 }
   0x9   :  { %250 = vmatmul.mubr.msk.bf16.vlgmr.msra.gmra.mrb[0].mxu0 %vm47_vm1, %v23_v6  ;;  %257 = vmatprep.subr.bf16.mxu1 %v310_v1 }
   0xa   :  { %10 = vsyncpa [#allocation3], 0  ;;  %v281_v8 = vld [vmem:[%s397_s3 + $0x18] sm:$0xff]   ;;  %v282_v9 = vld [vmem:[%s397_s3 + $0x20] sm:$0xff]   ;;  %s312_s17 = smov [#allocation2]   ;;  %vm204_vm2 = vcmask 9216  }
   0xb   :  { %v283_v10 = vld [vmem:[%s397_s3 + $0x28] sm:$0xff]   ;;  %v284_v11 = vld [vmem:[%s397_s3 + $0x30] sm:$0xff]   ;;  %v285_v12 = vld [vmem:[%s397_s3 + $0x38] sm:$0xff]   ;;  %s212_s18 = sshll.u32 %s312_s17, 4  ;;  %s213_s18 = int_to_ptr.vmem [resolvable:$true] %s212_s18 }
   0xc   :  { %258 = vmatpush3.bf16.msra.mxu1 %v280_v7  ;;  %v220_v13 = vld [vmem:[%s396_s2] ss:$0 sm:$0xff]  ;;  %s286_s2 = scalar_lea.vmem %s213_s18, 32  ;;  %p291_p1 = scmp.lt.s32.totalorder %s213_s18, %s213_s18 }
   0xd   :  { %259 = vmatprep.subr.bf16.mxu1 %v310_v1  ;;  %v224_v21 = vld [vmem:[%s398_s4] ss:$0 sm:$0xff]  ;;  %p287_p0 = scmp.ne.s32.totalorder %s213_s18, %s286_s2  ;;  %p292_p2 = scmp.lt.s32.totalorder %s286_s2, %s286_s2 }
   0xf   :  { %p293_p3 = por %p292_p2, %p291_p1 }
  0x10   :  { %260 = vmatpush3.bf16.msra.mxu1 %v281_v8 }
  0x11   :  { %261 = vmatprep.subr.bf16.mxu1 %v310_v1  ;;  %p294_p4 = pnand %p293_p3, %p287_p0 }
  0x14   :  { %262 = vmatpush3.bf16.msra.mxu1 %v282_v9 }
  0x15   :  { %263 = vmatprep.subr.bf16.mxu1 %v310_v1 }
  0x18   :  { %264 = vmatpush3.bf16.msra.mxu1 %v283_v10 }
  0x19   :  { %265 = vmatprep.subr.bf16.mxu1 %v310_v1 }
  0x1c   :  { %266 = vmatpush3.bf16.msra.mxu1 %v284_v11 }
  0x1d   :  { %267 = vmatprep.subr.bf16.mxu1 %v310_v1 }
  0x20   :  { %268 = vmatpush3.bf16.msra.mxu1 %v285_v12 }
  0xdc   :  { %v85_v14 = vpop.f32.mrb[0].mxu0 }
  0xdd   :  { %v86_v15 = vadd.f32 %v220_v13, %v85_v14  ;;  %v251_v16 = vpop.f32.mrb[1].mxu0 }
  0xde   :  { %v88_v17 = vpop.f32.mrb[2].mxu0 }
  0xdf   :  { %v91_v18 = vmax.f32 %v86_v15, 0.0  ;;  %v252_v19 = vpop.f32.mrb[3].mxu0 }
  0xe1   :  { %v92_v20 = vpack.c.bf16 %v91_v18, %v91_v18 }
  0xe3   :  { %270 = vmatmul.mubr.bf16.vlgmr.msra.gmra.mrb[0].mxu1 %v92_v20 }
 0x1b6   :  { %v198_v22 = vpop.f32.mrb[0].mxu1 }
 0x1b7   :  { %v199_v23 = vadd.f32 %v224_v21, %v198_v22  ;;  %v271_v24 = vpop.f32.mrb[1].mxu1 }
 0x1b8   :  { %v201_v25 = vpop.f32.mrb[2].mxu1 }
 0x1b9   :  { %v272_v26 = vpop.f32.mrb[3].mxu1  ;;  %205 = vst.msk [vmem:[#allocation2] sm:$0x3] %vm204_vm2, %v199_v23 }
 0x1ba   :  { %297 = shalt.err (!%p294_p4)
}
 0x1bb   :  { %s298_s4 = scalar_lea.hbm %s399_s5, 32 }
 0x1bc   :  { %p299_p5 = scmp.ne.s32.totalorder %s399_s5, %s298_s4  ;;  %p302_p6 = scmp.lt.u32.totalorder %s298_s4, %s399_s5 }
 0x1be   :  { %p304_p7 = pnand %p302_p6, %p299_p5 }
 0x1c0   :  { %307 = shalt.err (!%p304_p7)
}
 0x1c1   :  { %215 = dma.vmem_to_hbm [thread:$0]  %s213_s18, 32, %s399_s5, [#allocation3]  }
 0x1c2   :  { %308 = dma.done.wait [#allocation3], 32  }
 0x1c3   :  { %309 = vsyncadd [#allocation3], 4294967264 }
 0x1c4   :  { %219 = vsyncpa [#allocation3], 1 }

</bundles_post_ra>
